<compile_context>
chip_gen: v5e
topology: v5e:2x2
jax: 0.10.0
libtpu: 0.0.40
codegen_flags: <defaults>
</compile_context>

<pallas_src>
import jax
import jax.numpy as jnp
from jax.experimental import pallas as pl
from jax.experimental.pallas import tpu as pltpu


def _round_up(x, m):
    return ((x + m - 1) // m) * m


def _airl_kernel(s_ref, a_ref, ns_ref,
                 ws_ref, wa_ref, wn_ref,
                 consts_ref, bias_ref,
                 out_ref):
    # Fused first layer (bf16 operands, f32 accumulate):
    #   hidden columns = [g pre-act | h(s) pre-act | h(next_s) pre-act | 0-pad]
    hid = (jnp.dot(s_ref[...], ws_ref[...], preferred_element_type=jnp.float32)
           + jnp.dot(a_ref[...], wa_ref[...], preferred_element_type=jnp.float32)
           + jnp.dot(ns_ref[...], wn_ref[...], preferred_element_type=jnp.float32))
    c = consts_ref[...]                        # (2, h_pad) f32: row0 = b1, row1 = coef
    hid = jnp.maximum(hid + c[0:1, :], 0.0)    # full-lane bias add + ReLU

    # Fused second layer:
    #   out[b] = sum_h hid[b, h] * [wg2 | -wh2 | gamma*wh2 | 0][h] + fused_bias
    # Computed as a (1, h_pad) x (tile_b, h_pad)^T contraction so the result
    # is directly lane-dense (1, tile_b) — no skinny column output.
    red = jnp.einsum('oh,bh->ob', c[1:2, :], hid,
                     preferred_element_type=jnp.float32)      # (1, tile_b)
    out_ref[...] = (red + bias_ref[0, 0]).reshape(out_ref.shape)


def build_fused(params, gamma, compute_dtype=jnp.bfloat16):
    """Assemble block-structured weights once so the kernel runs one fused
    layer-1 matmul group and one fused layer-2 contraction.  gamma is folded
    into runtime arrays, so changing gamma does not recompile the kernel."""
    wg1_s, wg1_a, wh1 = params["wg1_s"], params["wg1_a"], params["wh1"]
    s_dim, h_dim = wh1.shape
    a_dim = wg1_a.shape[0]
    g = jnp.float32(gamma)

    h_pad = _round_up(3 * h_dim, 128)          # full-lane hidden width
    pad = h_pad - 3 * h_dim

    zs = jnp.zeros((s_dim, h_dim), jnp.float32)
    za = jnp.zeros((a_dim, h_dim), jnp.float32)
    ps = jnp.zeros((s_dim, pad), jnp.float32)
    pa = jnp.zeros((a_dim, pad), jnp.float32)
    pr = jnp.zeros((1, pad), jnp.float32)

    # hidden columns: [0:h) -> g pre-act, [h:2h) -> h(s) pre-act, [2h:3h) -> h(ns) pre-act
    w_s = jnp.concatenate([wg1_s, wh1, zs, ps], axis=1)       # (s_dim, h_pad)
    w_a = jnp.concatenate([wg1_a, za, za, pa], axis=1)        # (a_dim, h_pad)
    w_n = jnp.concatenate([zs, zs, wh1, ps], axis=1)          # (s_dim, h_pad)
    b1 = jnp.concatenate([params["bg1"], params["bh1"], params["bh1"], pr], axis=1)

    wg2_row = params["wg2"].reshape(1, h_dim)
    wh2_row = params["wh2"].reshape(1, h_dim)
    coef = jnp.concatenate([wg2_row, -wh2_row, g * wh2_row, pr], axis=1)   # (1, h_pad)

    consts = jnp.concatenate([b1, coef], axis=0)               # (2, h_pad) f32, resident
    out_bias = (params["bg2"] + (g - 1.0) * params["bh2"]).reshape(1, 1)   # (1, 1) f32

    return {
        "w_s": w_s.astype(compute_dtype),
        "w_a": w_a.astype(compute_dtype),
        "w_n": w_n.astype(compute_dtype),
        "consts": consts,
        "out_bias": out_bias,
    }


def _choose_tiling(B, max_tile_b, min_split_b):
    """Pick (tile_b, grid_n). Single full-extent block when the batch is small
    (fewest grid steps); otherwise near-equal 16-row-aligned tiles.  Large
    batches are forced to >= 2 grid steps so v7x megacore can shard them."""
    if B <= max_tile_b and B < min_split_b:
        return B, 1
    grid_n = pl.cdiv(B, max_tile_b)
    if B >= min_split_b:
        grid_n = max(grid_n, 2)
    tile_b = _round_up(pl.cdiv(B, grid_n), 16)
    grid_n = pl.cdiv(B, tile_b)
    return tile_b, grid_n


def airl_forward(fused, s, a, next_s, max_tile_b=4096, min_split_b=2048):
    B, s_dim = s.shape
    a_dim = a.shape[1]
    h_pad = fused["consts"].shape[1]
    cdtype = fused["w_s"].dtype

    # Stream activations in bf16 (halves HBM traffic); f32 MXU accumulate in-kernel.
    s = s.astype(cdtype)
    a = a.astype(cdtype)
    next_s = next_s.astype(cdtype)

    tile_b, grid_n = _choose_tiling(B, max_tile_b, min_split_b)

    # NOTE(v5e): if a profile shows exposed activation DMA, add
    # pipeline_mode=pl.Buffered(3) to the three batch_spec inputs.
    def batch_spec(feat):
        return pl.BlockSpec((tile_b, feat), lambda i: (i, 0))

    def const_spec(shape):
        return pl.BlockSpec(shape, lambda i: (0, 0))

    out = pl.pallas_call(
        _airl_kernel,
        out_shape=jax.ShapeDtypeStruct((grid_n, 1, tile_b), jnp.float32),
        grid=(grid_n,),
        in_specs=[
            batch_spec(s_dim),            # s
            batch_spec(a_dim),            # a
            batch_spec(s_dim),            # next_s
            const_spec((s_dim, h_pad)),   # fused W for s
            const_spec((a_dim, h_pad)),   # fused W for a
            const_spec((s_dim, h_pad)),   # fused W for next_s
            const_spec((2, h_pad)),       # [layer-1 bias ; layer-2 coef (incl. gamma)]
            pl.BlockSpec(memory_space=pltpu.MemorySpace.SMEM),  # fused output bias scalar
        ],
        out_specs=pl.BlockSpec((1, 1, tile_b), lambda i: (i, 0, 0)),
        compiler_params=pltpu.CompilerParams(
            dimension_semantics=("parallel",)),
    )(s, a, next_s, fused["w_s"], fused["w_a"], fused["w_n"],
      fused["consts"], fused["out_bias"])

    # Lane-dense (grid_n, 1, tile_b) -> (B, 1); garbage tail rows (ragged last
    # tile) are sliced off here.
    return out.reshape(-1)[:B].reshape(B, 1)


def init_params(key, s_dim, a_dim, h_dim):
    ks = jax.random.split(key, 4)

    def lin(k, fan_in, fan_out):
        bound = 1.0 / jnp.sqrt(fan_in)
        kw, kb = jax.random.split(k)
        w = jax.random.uniform(kw, (fan_in, fan_out), jnp.float32, -bound, bound)
        b = jax.random.uniform(kb, (1, fan_out), jnp.float32, -bound, bound)
        return w, b

    wg1, bg1 = lin(ks[0], s_dim + a_dim, h_dim)   # g layer 1
    wg2, bg2 = lin(ks[1], h_dim, 1)               # g layer 2
    wh1, bh1 = lin(ks[2], s_dim, h_dim)           # h layer 1
    wh2, bh2 = lin(ks[3], h_dim, 1)               # h layer 2
    return {
        "wg1_s": wg1[:s_dim], "wg1_a": wg1[s_dim:], "bg1": bg1,
        "wg2": wg2, "bg2": bg2,
        "wh1": wh1, "bh1": bh1,
        "wh2": wh2, "bh2": bh2,
    }


def airl_reference(params, s, a, next_s, gamma, cast_dtype=None):
    """Pure-JAX reference. If cast_dtype is given, activations and layer-1
    weights are round-tripped through it (matches the kernel's bf16 streaming)."""
    def c(x):
        return x.astype(cast_dtype).astype(jnp.float32) if cast_dtype is not None else x

    s_, a_, ns_ = c(s), c(a), c(next_s)
    wg1_s, wg1_a, wh1 = c(params["wg1_s"]), c(params["wg1_a"]), c(params["wh1"])

    def g(x_s, x_a):
        hid = jnp.maximum(x_s @ wg1_s + x_a @ wg1_a + params["bg1"], 0.0)
        return hid @ params["wg2"] + params["bg2"]

    def h(x):
        hid = jnp.maximum(x @ wh1 + params["bh1"], 0.0)
        return hid @ params["wh2"] + params["bh2"]

    return g(s_, a_) + gamma * h(ns_) - h(s_)


if __name__ == "__main__":
    gamma = 0.99
    batch, s_dim, a_dim, h_dim = 8, 16, 8, 32

    key = jax.random.PRNGKey(0)
    kp, ks, ka, kn = jax.random.split(key, 4)
    params = init_params(kp, s_dim, a_dim, h_dim)
    fused = build_fused(params, gamma)                 # built once, reused across calls

    fwd = jax.jit(airl_forward, static_argnames=("max_tile_b", "min_split_b"))

    s = jax.random.normal(ks, (batch, s_dim), jnp.float32)
    a = jax.random.normal(ka, (batch, a_dim), jnp.float32)
    next_s = jax.random.normal(kn, (batch, s_dim), jnp.float32)

    out = jax.block_until_ready(fwd(fused, s, a, next_s))
    assert out.shape == (batch, 1)
    # Tight check vs a reference that uses the same bf16-streamed operands.
    ref_bf16 = airl_reference(params, s, a, next_s, gamma, cast_dtype=jnp.bfloat16)
    assert jnp.allclose(out, ref_bf16, atol=1e-3, rtol=1e-3)
    # Loose check vs the full-f32 reference (bf16 streaming error budget).
    ref_f32 = airl_reference(params, s, a, next_s, gamma)
    assert jnp.allclose(out, ref_f32, atol=5e-2, rtol=5e-2)

    # Multi-tile grid + ragged batch (B not a multiple of tile_b), no input pad.
    kb = jax.random.PRNGKey(1)
    k1, k2, k3 = jax.random.split(kb, 3)
    B2 = 300
    s2 = jax.random.normal(k1, (B2, s_dim), jnp.float32)
    a2 = jax.random.normal(k2, (B2, a_dim), jnp.float32)
    ns2 = jax.random.normal(k3, (B2, s_dim), jnp.float32)
    out2 = jax.block_until_ready(fwd(fused, s2, a2, ns2, max_tile_b=128))
    assert out2.shape == (B2, 1)
    assert jnp.allclose(
        out2, airl_reference(params, s2, a2, ns2, gamma, cast_dtype=jnp.bfloat16),
        atol=1e-3, rtol=1e-3)

    # Large batch: exercises the forced >= 2 grid-step (v7x megacore) split.
    kc = jax.random.PRNGKey(2)
    k4, k5, k6 = jax.random.split(kc, 3)
    B3 = 2500
    s3 = jax.random.normal(k4, (B3, s_dim), jnp.float32)
    a3 = jax.random.normal(k5, (B3, a_dim), jnp.float32)
    ns3 = jax.random.normal(k6, (B3, s_dim), jnp.float32)
    out3 = jax.block_until_ready(fwd(fused, s3, a3, ns3))
    assert out3.shape == (B3, 1)
    assert jnp.allclose(
        out3, airl_reference(params, s3, a3, ns3, gamma, cast_dtype=jnp.bfloat16),
        atol=1e-3, rtol=1e-3)

    print("KERNEL_OK")
</pallas_src>

<mosaic_0001>
module attributes {stable_mosaic.version = 11 : i64} {
  func.func @_airl_kernel(%arg0: i32, %arg1: memref<8x16xbf16, #tpu.memory_space<vmem>>, %arg2: memref<8x8xbf16, #tpu.memory_space<vmem>>, %arg3: memref<8x16xbf16, #tpu.memory_space<vmem>>, %arg4: memref<16x128xbf16, #tpu.memory_space<vmem>>, %arg5: memref<8x128xbf16, #tpu.memory_space<vmem>>, %arg6: memref<16x128xbf16, #tpu.memory_space<vmem>>, %arg7: memref<2x128xf32, #tpu.memory_space<vmem>>, %arg8: memref<1x1xf32, #tpu.memory_space<smem>>, %arg9: memref<1x1x8xf32, #tpu.memory_space<vmem>>) attributes {dimension_semantics = [#tpu.dimension_semantics<parallel>], iteration_bounds = array<i64: 1>, scalar_prefetch = 0 : i64, scratch_operands = 0 : i64, tpu.core_type = #tpu.core_type<tc>, window_params = [{transform_indices = @transform_0, window_bounds = array<i64: 8, 16>}, {transform_indices = @transform_1, window_bounds = array<i64: 8, 8>}, {transform_indices = @transform_2, window_bounds = array<i64: 8, 16>}, {pipeline_mode = #tpu.pipeline_mode<synchronous>, transform_indices = @transform_3, window_bounds = array<i64: 16, 128>}, {pipeline_mode = #tpu.pipeline_mode<synchronous>, transform_indices = @transform_4, window_bounds = array<i64: 8, 128>}, {pipeline_mode = #tpu.pipeline_mode<synchronous>, transform_indices = @transform_5, window_bounds = array<i64: 16, 128>}, {pipeline_mode = #tpu.pipeline_mode<synchronous>, transform_indices = @transform_6, window_bounds = array<i64: 2, 128>}, {transform_indices = @transform_7, window_bounds = array<i64: 1, 1>}, {transform_indices = @transform_8, window_bounds = array<i64: 1, 1, 8>}]} {
    %c0 = arith.constant 0 : index
    %c0_0 = arith.constant 0 : index
    %0 = vector.load %arg1[%c0, %c0_0] : memref<8x16xbf16, #tpu.memory_space<vmem>>, vector<8x16xbf16>
    %c0_1 = arith.constant 0 : index
    %c0_2 = arith.constant 0 : index
    %1 = vector.load %arg4[%c0_1, %c0_2] : memref<16x128xbf16, #tpu.memory_space<vmem>>, vector<16x128xbf16>
    %cst = arith.constant dense<0.000000e+00> : vector<8x128xf32>
    %2 = tpu.matmul %0, %1, %cst {dimension_numbers = #tpu.dot_dimension_numbers<[1], [0], [0], [1], [0, 0, 1, 1], [], []>} : vector<8x16xbf16>, vector<16x128xbf16>, vector<8x128xf32> -> vector<8x128xf32>
    %c0_3 = arith.constant 0 : index
    %c0_4 = arith.constant 0 : index
    %3 = vector.load %arg2[%c0_3, %c0_4] : memref<8x8xbf16, #tpu.memory_space<vmem>>, vector<8x8xbf16>
    %c0_5 = arith.constant 0 : index
    %c0_6 = arith.constant 0 : index
    %4 = vector.load %arg5[%c0_5, %c0_6] : memref<8x128xbf16, #tpu.memory_space<vmem>>, vector<8x128xbf16>
    %cst_7 = arith.constant dense<0.000000e+00> : vector<8x128xf32>
    %5 = tpu.matmul %3, %4, %cst_7 {dimension_numbers = #tpu.dot_dimension_numbers<[1], [0], [0], [1], [0, 0, 1, 1], [], []>} : vector<8x8xbf16>, vector<8x128xbf16>, vector<8x128xf32> -> vector<8x128xf32>
    %6 = arith.addf %2, %5 : vector<8x128xf32>
    %c0_8 = arith.constant 0 : index
    %c0_9 = arith.constant 0 : index
    %7 = vector.load %arg3[%c0_8, %c0_9] : memref<8x16xbf16, #tpu.memory_space<vmem>>, vector<8x16xbf16>
    %c0_10 = arith.constant 0 : index
    %c0_11 = arith.constant 0 : index
    %8 = vector.load %arg6[%c0_10, %c0_11] : memref<16x128xbf16, #tpu.memory_space<vmem>>, vector<16x128xbf16>
    %cst_12 = arith.constant dense<0.000000e+00> : vector<8x128xf32>
    %9 = tpu.matmul %7, %8, %cst_12 {dimension_numbers = #tpu.dot_dimension_numbers<[1], [0], [0], [1], [0, 0, 1, 1], [], []>} : vector<8x16xbf16>, vector<16x128xbf16>, vector<8x128xf32> -> vector<8x128xf32>
    %10 = arith.addf %6, %9 : vector<8x128xf32>
    %c0_13 = arith.constant 0 : index
    %c0_14 = arith.constant 0 : index
    %11 = vector.load %arg7[%c0_13, %c0_14] : memref<2x128xf32, #tpu.memory_space<vmem>>, vector<2x128xf32>
    %12 = vector.extract_strided_slice %11 {offsets = [0, 0], sizes = [1, 128], strides = [1, 1]} : vector<2x128xf32> to vector<1x128xf32>
    %13 = vector.broadcast %12 : vector<1x128xf32> to vector<8x128xf32>
    %14 = arith.addf %10, %13 : vector<8x128xf32>
    %cst_15 = arith.constant 0.000000e+00 : f32
    %15 = vector.broadcast %cst_15 : f32 to vector<8x128xf32>
    %16 = arith.maximumf %14, %15 : vector<8x128xf32>
    %17 = vector.extract_strided_slice %11 {offsets = [1, 0], sizes = [1, 128], strides = [1, 1]} : vector<2x128xf32> to vector<1x128xf32>
    "tpu.trace_start"() <{level = 10 : i32, message = "oh,bh->ob"}> : () -> ()
    %cst_16 = arith.constant dense<0.000000e+00> : vector<1x8xf32>
    %18 = tpu.matmul %17, %16, %cst_16 {dimension_numbers = #tpu.dot_dimension_numbers<[1], [1], [0], [0], [0, 0, 1, 0], [], []>} : vector<1x128xf32>, vector<8x128xf32>, vector<1x8xf32> -> vector<1x8xf32>
    "tpu.trace_stop"() : () -> ()
    %c0_17 = arith.constant 0 : index
    %c0_18 = arith.constant 0 : index
    %19 = memref.load %arg8[%c0_17, %c0_18] : memref<1x1xf32, #tpu.memory_space<smem>>
    %20 = vector.broadcast %19 : f32 to vector<1x8xf32>
    %21 = arith.addf %18, %20 : vector<1x8xf32>
    %22 = vector.shape_cast %21 : vector<1x8xf32> to vector<1x1x8xf32>
    %c0_19 = arith.constant 0 : index
    %c0_20 = arith.constant 0 : index
    %c0_21 = arith.constant 0 : index
    %23 = vector.load %arg9[%c0_19, %c0_20, %c0_21] : memref<1x1x8xf32, #tpu.memory_space<vmem>>, vector<1x1x8xf32>
    tpu.vector_store %arg9[%c0_19, %c0_20, %c0_21], %22 {strides = array<i32>} : memref<1x1x8xf32, #tpu.memory_space<vmem>>, vector<1x1x8xf32>,
    return
  }
  func.func @transform_0(%arg0: i32) -> (i32, i32) {
    %c0_i32 = arith.constant 0 : i32
    %c0_i32_0 = arith.constant 0 : i32
    return %arg0, %c0_i32 : i32, i32
  }
  func.func @transform_1(%arg0: i32) -> (i32, i32) {
    %c0_i32 = arith.constant 0 : i32
    %c0_i32_0 = arith.constant 0 : i32
    return %arg0, %c0_i32 : i32, i32
  }
  func.func @transform_2(%arg0: i32) -> (i32, i32) {
    %c0_i32 = arith.constant 0 : i32
    %c0_i32_0 = arith.constant 0 : i32
    return %arg0, %c0_i32 : i32, i32
  }
  func.func @transform_3(%arg0: i32) -> (i32, i32) {
    %c0_i32 = arith.constant 0 : i32
    %c0_i32_0 = arith.constant 0 : i32
    %c0_i32_1 = arith.constant 0 : i32
    return %c0_i32, %c0_i32_0 : i32, i32
  }
  func.func @transform_4(%arg0: i32) -> (i32, i32) {
    %c0_i32 = arith.constant 0 : i32
    %c0_i32_0 = arith.constant 0 : i32
    %c0_i32_1 = arith.constant 0 : i32
    return %c0_i32, %c0_i32_0 : i32, i32
  }
  func.func @transform_5(%arg0: i32) -> (i32, i32) {
    %c0_i32 = arith.constant 0 : i32
    %c0_i32_0 = arith.constant 0 : i32
    %c0_i32_1 = arith.constant 0 : i32
    return %c0_i32, %c0_i32_0 : i32, i32
  }
  func.func @transform_6(%arg0: i32) -> (i32, i32) {
    %c0_i32 = arith.constant 0 : i32
    %c0_i32_0 = arith.constant 0 : i32
    %c0_i32_1 = arith.constant 0 : i32
    return %c0_i32, %c0_i32_0 : i32, i32
  }
  func.func @transform_7(%arg0: i32) -> (i32, i32) {
    %c0_i32 = arith.constant 0 : i32
    %c0_i32_0 = arith.constant 0 : i32
    %c0_i32_1 = arith.constant 0 : i32
    return %c0_i32, %c0_i32_0 : i32, i32
  }
  func.func @transform_8(%arg0: i32) -> (i32, i32, i32) {
    %c0_i32 = arith.constant 0 : i32
    %c0_i32_0 = arith.constant 0 : i32
    %c0_i32_1 = arith.constant 0 : i32
    return %arg0, %c0_i32, %c0_i32_0 : i32, i32, i32
  }
}

</mosaic_0001>

<bundles_post_ra>
// kernel: airl_forward.1
= control target key start
LH: loop header
LB: loop body
LE: loop exit
PB: predicated region body
PF: predicated region fallthrough
CT: control target
= control target key end

     0   :  { %vm41_vm0 = vcmask 1043456   ;;  %vm37_vm1 = vcmask 64512   ;;  %vm64_vm2 = vcmask 130048   ;;  %s267_s0 = inlined_call_operand.vmem [shape: bf16[8,16], index: 0, kind: input, shape index: {}]   ;;  %s268_s1 = inlined_call_operand.vmem [shape: bf16[8,8], index: 1, kind: input, shape index: {}]   ;;  %s269_s2 = inlined_call_operand.vmem [shape: bf16[8,16], index: 2, kind: input, shape index: {}]   ;;  %s270_s3 = inlined_call_operand.vmem [shape: bf16[16,128], index: 3, kind: input, shape index: {}]   ;;  %s271_s4 = inlined_call_operand.vmem [shape: bf16[8,128], index: 4, kind: input, shape index: {}]   ;;  %s272_s5 = inlined_call_operand.vmem [shape: bf16[16,128], index: 5, kind: input, shape index: {}]   ;;  %s273_s6 = inlined_call_operand.vmem [shape: f32[2,128], index: 6, kind: input, shape index: {}]   ;;  %s274_s7 = inlined_call_operand.<no memory space> [shape: f32[1,1], index: 7, kind: input, shape index: {}]   ;;  %s275_s8 = inlined_call_operand.hbm [shape: f32[1,1,8], index: 8, kind: output, shape index: {}]  }
   0x1   :  { %v36_v0 = vld [vmem:[%s271_s4] sm:$0xf] }
   0x2   :  { %v165_v1 = vld [vmem:[%s270_s3] sm:$0xff]  ;;  %v43_v3 = vsel %vm41_vm0, %v36_v0, 0 }
   0x3   :  { %v166_v2 = vld [vmem:[%s272_s5] sm:$0xff]  ;;  %52 = vmatpush.bf16.msra.mxu0 %v43_v3  ;;  %75 = vmatpush.bf16.msra.mxu1 %v165_v1 }
   0x4   :  { %v35_v4 = vld [vmem:[%s268_s1] sm:$0xf] }
   0x5   :  { %v32_v5 = vld [vmem:[%s267_s0] sm:$0xf] }
   0x6   :  { %14 = vsyncpa [#allocation4], 0  ;;  %100 = vmatpush.bf16.msra.mxu2 %v166_v2  ;;  %v81_v6 = vld [vmem:[%s269_s2] sm:$0xf]  ;;  %154 = vmatmul.msk.bf16.vlgmr.msra.gmra.mxu0 %vm37_vm1, %v35_v4  ;;  %v112_v20 = vstv %s274_s7  ;;  %s194_s15 = smov [#allocation3]   ;;  %s145_s18 = sshll.u32 %s275_s8, 4  ;;  %s146_s18 = int_to_ptr.hbm [resolvable:$true] %s145_s18 }
   0x7   :  { %159 = vmatmul.msk.bf16.vlgmr.msra.gmra.mxu1 %vm64_vm2, %v32_v5  ;;  %v107_v9 = vld [vmem:[%s273_s6] sm:$0x3]  ;;  %s143_s16 = sshll.u32 %s194_s15, 4  ;;  %vm136_vm3 = vcmask 57344   ;;  %s144_s16 = int_to_ptr.vmem [resolvable:$true] %s143_s16 }
   0x8   :  { %v108_v11 = vperm.slane %v107_v9, 0  ;;  %v114_v18 = vrot.slane %v107_v9, 1 }
   0x9   :  { %164 = vmatmul.msk.bf16.vlgmr.msra.gmra.mxu2 %vm64_vm2, %v81_v6 }
  0x83   :  { %v54_v7 = vpop.f32.mrf.mxu0 }
  0x84   :  { %v77_v8 = vpop.f32.mrf.mxu1 }
  0x85   :  { %v78_v10 = vadd.f32 %v77_v8, %v54_v7 }
  0x8b   :  { %v56_v14 = vpop.f32.mrf.mxu0 }
  0x8c   :  { %v102_v12 = vpop.f32.mrf.mxu2  ;;  %v79_v15 = vpop.f32.mrf.mxu1 }
  0x8d   :  { %v106_v13 = vadd.f32 %v102_v12, %v78_v10 }
  0x8f   :  { %v109_v16 = vadd.f32 %v108_v11, %v106_v13 }
  0x91   :  { %v110_v17 = vmax.f32 %v109_v16, 0.0 }
  0x93   :  { %131 = vmatpush.xpose.msra.mxu3 %v110_v17 }
  0x94   :  { %v104_v19 = vpop.f32.mrf.mxu2 }
  0x96   :  { %132 = vmatmul.f32.vlgmr.msra.gmra.mxu3 %v114_v18 }
 0x119   :  { %v133_v21 = vpop.f32.mrf.mxu3 }
 0x11a   :  { %v134_v22 = vadd.f32 %v133_v21, %v112_v20 }
 0x11c   :  { %137 = vst.msk [vmem:[#allocation3] sm:$0x1] %vm136_vm3, %v134_v22 }
 0x11d   :  { %148 = dma.vmem_to_hbm [thread:$0]  %s144_s16, 16, %s146_s18, [#allocation4]  }
 0x11e   :  { %192 = dma.done.wait [#allocation4], 16  }
 0x11f   :  { %193 = vsyncadd [#allocation4], 4294967280 }
 0x120   :  { %153 = vsyncpa [#allocation4], 1 }

</bundles_post_ra>
